<compile_context>
chip_gen: v7x
topology: tpu7x:2x2x1
jax: 0.10.0
libtpu: 0.0.40
codegen_flags: <defaults>
</compile_context>

<pallas_src>
import jax
import jax.numpy as jnp
from jax.experimental import pallas as pl
from jax.experimental.pallas import tpu as pltpu


def conv_bn_relu_kernel(x_ref, w_ref, scale_ref, shift_ref, o_ref):
    # x_ref:     (C1, TS)  spatial tile of one image (channels on sublanes,
    #                      spatial on lanes -> lane-dense input AND output)
    # w_ref:     (C2, C1)  1x1-conv weight (input dtype), resident
    # scale_ref: (C2, 1)   folded BN scale  gamma / sqrt(var + eps), f32
    # shift_ref: (C2, 1)   folded BN shift  beta - mean * scale,     f32
    # o_ref:     (C2, TS)
    y = jnp.dot(w_ref[...], x_ref[...], preferred_element_type=jnp.float32)  # MXU
    y = y * scale_ref[...] + shift_ref[...]                    # BatchNorm (eval), f32
    o_ref[...] = jnp.maximum(y, 0.0).astype(o_ref.dtype)       # ReLU + store-cast


def _floor_to_128(v):
    return max(128, (v // 128) * 128)


def _block_spec(shape, index_map, buffer_count=None):
    """BlockSpec with optional pipeline depth; falls back if unsupported."""
    if buffer_count is not None:
        try:
            return pl.BlockSpec(shape, index_map,
                                pipeline_mode=pl.Buffered(buffer_count))
        except (TypeError, AttributeError):
            pass
    return pl.BlockSpec(shape, index_map)


def conv_module_forward(x_nchw, conv_w, bn_gamma, bn_beta, bn_mean, bn_var,
                        eps=1e-3, out_dtype=None):
    """x_nchw: (N, C1, H, W). conv_w: (C2, C1, 1, 1). Returns (N, C2, H, W).

    Output dtype defaults to x_nchw.dtype (pass bf16 activations/weights on
    v6e/v7x to halve HBM traffic); compute/BN/ReLU are always f32 in-kernel.
    """
    N, C1, H, W = x_nchw.shape
    C2 = conv_w.shape[0]
    HW = H * W
    out_dtype = x_nchw.dtype if out_dtype is None else jnp.dtype(out_dtype)

    in_bytes = jnp.dtype(x_nchw.dtype).itemsize
    out_bytes = jnp.dtype(out_dtype).itemsize

    # ---- Eval-mode BN as per-channel f32 scale/shift (applied in epilogue) ---
    scale = (bn_gamma.astype(jnp.float32)
             / jnp.sqrt(bn_var.astype(jnp.float32) + eps)).reshape(C2, 1)
    shift = (bn_beta.astype(jnp.float32).reshape(C2, 1)
             - bn_mean.astype(jnp.float32).reshape(C2, 1) * scale)
    w2d = conv_w.reshape(C2, C1).astype(x_nchw.dtype)        # 1x1 conv == matmul

    # ---- Consume NCHW directly: (N, C1, H*W); row-major reshape is free -----
    x3d = x_nchw.reshape(N, C1, HW)

    # ---- VMEM-aware spatial tile --------------------------------------------
    try:
        vmem_cap = int(pltpu.get_tpu_info().vmem_capacity_bytes)
    except Exception:
        vmem_cap = 64 * 1024 * 1024          # conservative default (v7x per-TC)

    weight_bytes = C2 * C1 * in_bytes + 2 * C2 * 4             # resident operands
    budget = max(0, vmem_cap // 2 - weight_bytes)               # half of VMEM for the pipeline
    bytes_per_lane = 2 * C1 * in_bytes + 2 * C2 * out_bytes     # dbl-buffered x + out
    ts = _floor_to_128(budget // max(1, bytes_per_lane))
    ts = min(ts, 4096, pl.cdiv(HW, 128) * 128)
    if N == 1 and HW > 128:
        # keep >= 2 independent grid steps so both TensorCores get work (v7x)
        ts = min(ts, max(128, pl.cdiv(pl.cdiv(HW, 2), 128) * 128))
    if HW <= ts:
        ts = HW                              # single full-width tile, no masking needed
    grid = (N, pl.cdiv(HW, ts))

    est_footprint = (2 * C1 * ts * in_bytes + 2 * C2 * ts * out_bytes
                     + weight_bytes)
    vmem_limit = min(int(vmem_cap * 0.7),
                     max(2 * est_footprint, 32 * 1024 * 1024))

    out3d = pl.pallas_call(
        conv_bn_relu_kernel,
        out_shape=jax.ShapeDtypeStruct((N, C2, HW), out_dtype),
        grid_spec=pltpu.PrefetchScalarGridSpec(
            num_scalar_prefetch=0,
            grid=grid,
            in_specs=[
                pl.BlockSpec((None, C1, ts), lambda n, s: (n, 0, s)),    # x tile
                _block_spec((C2, C1), lambda n, s: (0, 0), buffer_count=1),  # weight
                _block_spec((C2, 1), lambda n, s: (0, 0), buffer_count=1),   # bn scale
                _block_spec((C2, 1), lambda n, s: (0, 0), buffer_count=1),   # bn shift
            ],
            out_specs=pl.BlockSpec((None, C2, ts), lambda n, s: (n, 0, s)),
        ),
        compiler_params=pltpu.CompilerParams(
            dimension_semantics=("parallel", "parallel"),
            vmem_limit_bytes=vmem_limit,
        ),
        cost_estimate=pl.CostEstimate(
            flops=2 * N * HW * C1 * C2,
            bytes_accessed=(N * HW * (C1 * in_bytes + C2 * out_bytes)
                            + C2 * C1 * in_bytes + 2 * C2 * 4),
            transcendentals=0,
        ),
    )(x3d, w2d, scale, shift)

    return out3d.reshape(N, C2, H, W)        # free reshape back to NCHW


def _reference(x_nchw, conv_w, bn_gamma, bn_beta, bn_mean, bn_var, eps=1e-3):
    # Pure-JAX reference of the same (eval-mode) forward for validation.
    y = jnp.einsum("nchw,oc->nohw", x_nchw, conv_w.reshape(conv_w.shape[0], -1))
    scale = bn_gamma / jnp.sqrt(bn_var + eps)
    shift = bn_beta - bn_mean * scale
    y = y * scale[None, :, None, None] + shift[None, :, None, None]
    return jnp.maximum(y, 0.0)


if __name__ == "__main__":
    key = jax.random.PRNGKey(0)
    k_x, k_w, k_g, k_b, k_m, k_v = jax.random.split(key, 6)

    N, C1, C2, H, W = 2, 4, 8, 16, 16   # ConvModule(c1=4, c2=8) defaults k=1,s=1,p=0,g=1

    x = jax.random.normal(k_x, (N, C1, H, W), dtype=jnp.float32)
    conv_w = jax.random.normal(k_w, (C2, C1, 1, 1), dtype=jnp.float32) * 0.1
    bn_gamma = 1.0 + 0.1 * jax.random.normal(k_g, (C2,), dtype=jnp.float32)
    bn_beta = 0.1 * jax.random.normal(k_b, (C2,), dtype=jnp.float32)
    bn_mean = 0.05 * jax.random.normal(k_m, (C2,), dtype=jnp.float32)
    bn_var = jnp.abs(jax.random.normal(k_v, (C2,), dtype=jnp.float32)) + 0.5

    # --- f32 path (output dtype follows input dtype) -------------------------
    out = conv_module_forward(x, conv_w, bn_gamma, bn_beta, bn_mean, bn_var)
    out = jax.block_until_ready(out)
    ref = _reference(x, conv_w, bn_gamma, bn_beta, bn_mean, bn_var)
    assert out.shape == (N, C2, H, W)
    assert out.dtype == x.dtype
    assert jnp.allclose(out, ref, atol=1e-4, rtol=1e-4), "f32 mismatch vs reference"

    # --- bf16 path (halved HBM traffic; bf16 in -> bf16 out, f32 compute) ----
    x_bf = x.astype(jnp.bfloat16)
    w_bf = conv_w.astype(jnp.bfloat16)
    out_bf = conv_module_forward(x_bf, w_bf, bn_gamma, bn_beta, bn_mean, bn_var)
    out_bf = jax.block_until_ready(out_bf)
    ref_bf = _reference(x_bf.astype(jnp.float32), w_bf.astype(jnp.float32),
                        bn_gamma, bn_beta, bn_mean, bn_var)
    assert out_bf.dtype == jnp.bfloat16
    assert jnp.allclose(out_bf.astype(jnp.float32), ref_bf, atol=5e-2, rtol=5e-2), \
        "bf16 mismatch vs reference"

    print("KERNEL_OK")
</pallas_src>

<mosaic_0001>
module attributes {stable_mosaic.version = 11 : i64} {
  func.func @conv_bn_relu_kernel(%arg0: i32, %arg1: i32, %arg2: memref<1x4x256xf32, #tpu.memory_space<vmem>>, %arg3: memref<8x4xf32, #tpu.memory_space<vmem>>, %arg4: memref<8x1xf32, #tpu.memory_space<vmem>>, %arg5: memref<8x1xf32, #tpu.memory_space<vmem>>, %arg6: memref<1x8x256xf32, #tpu.memory_space<vmem>>) attributes {dimension_semantics = [#tpu.dimension_semantics<parallel>, #tpu.dimension_semantics<parallel>], iteration_bounds = array<i64: 2, 1>, scalar_prefetch = 0 : i64, scratch_operands = 0 : i64, tpu.core_type = #tpu.core_type<tc>, window_params = [{transform_indices = @transform_0, window_bounds = array<i64: 1, 4, 256>}, {pipeline_mode = #tpu.pipeline_mode<synchronous>, transform_indices = @transform_1, window_bounds = array<i64: 8, 4>}, {pipeline_mode = #tpu.pipeline_mode<synchronous>, transform_indices = @transform_2, window_bounds = array<i64: 8, 1>}, {pipeline_mode = #tpu.pipeline_mode<synchronous>, transform_indices = @transform_3, window_bounds = array<i64: 8, 1>}, {transform_indices = @transform_4, window_bounds = array<i64: 1, 8, 256>}]} {
    %c0 = arith.constant 0 : index
    %c0_0 = arith.constant 0 : index
    %0 = vector.load %arg3[%c0, %c0_0] : memref<8x4xf32, #tpu.memory_space<vmem>>, vector<8x4xf32>
    %c0_1 = arith.constant 0 : index
    %c0_2 = arith.constant 0 : index
    %c0_3 = arith.constant 0 : index
    %1 = vector.load %arg2[%c0_1, %c0_2, %c0_3] : memref<1x4x256xf32, #tpu.memory_space<vmem>>, vector<1x4x256xf32>
    %2 = vector.shape_cast %1 : vector<1x4x256xf32> to vector<4x256xf32>
    %cst = arith.constant dense<0.000000e+00> : vector<8x256xf32>
    %3 = tpu.matmul %0, %2, %cst {dimension_numbers = #tpu.dot_dimension_numbers<[1], [0], [0], [1], [0, 0, 1, 1], [], []>} : vector<8x4xf32>, vector<4x256xf32>, vector<8x256xf32> -> vector<8x256xf32>
    %c0_4 = arith.constant 0 : index
    %c0_5 = arith.constant 0 : index
    %4 = vector.load %arg4[%c0_4, %c0_5] : memref<8x1xf32, #tpu.memory_space<vmem>>, vector<8x1xf32>
    %5 = vector.broadcast %4 : vector<8x1xf32> to vector<8x256xf32>
    %6 = arith.mulf %3, %5 : vector<8x256xf32>
    %c0_6 = arith.constant 0 : index
    %c0_7 = arith.constant 0 : index
    %7 = vector.load %arg5[%c0_6, %c0_7] : memref<8x1xf32, #tpu.memory_space<vmem>>, vector<8x1xf32>
    %8 = vector.broadcast %7 : vector<8x1xf32> to vector<8x256xf32>
    %9 = arith.addf %6, %8 : vector<8x256xf32>
    %cst_8 = arith.constant 0.000000e+00 : f32
    %10 = vector.broadcast %cst_8 : f32 to vector<8x256xf32>
    %11 = arith.maximumf %9, %10 : vector<8x256xf32>
    %c0_9 = arith.constant 0 : index
    %c0_10 = arith.constant 0 : index
    %c0_11 = arith.constant 0 : index
    %12 = vector.load %arg6[%c0_9, %c0_10, %c0_11] : memref<1x8x256xf32, #tpu.memory_space<vmem>>, vector<1x8x256xf32>
    %13 = vector.shape_cast %12 : vector<1x8x256xf32> to vector<8x256xf32>
    %14 = vector.shape_cast %11 : vector<8x256xf32> to vector<1x8x256xf32>
    tpu.vector_store %arg6[%c0_9, %c0_10, %c0_11], %14 {strides = array<i32>} : memref<1x8x256xf32, #tpu.memory_space<vmem>>, vector<1x8x256xf32>,
    return
  }
  func.func @transform_0(%arg0: i32, %arg1: i32) -> (i32, i32, i32) {
    %c0_i32 = arith.constant 0 : i32
    %c0_i32_0 = arith.constant 0 : i32
    return %arg0, %c0_i32, %arg1 : i32, i32, i32
  }
  func.func @transform_1(%arg0: i32, %arg1: i32) -> (i32, i32) {
    %c0_i32 = arith.constant 0 : i32
    %c0_i32_0 = arith.constant 0 : i32
    %c0_i32_1 = arith.constant 0 : i32
    return %c0_i32, %c0_i32_0 : i32, i32
  }
  func.func @transform_2(%arg0: i32, %arg1: i32) -> (i32, i32) {
    %c0_i32 = arith.constant 0 : i32
    %c0_i32_0 = arith.constant 0 : i32
    %c0_i32_1 = arith.constant 0 : i32
    return %c0_i32, %c0_i32_0 : i32, i32
  }
  func.func @transform_3(%arg0: i32, %arg1: i32) -> (i32, i32) {
    %c0_i32 = arith.constant 0 : i32
    %c0_i32_0 = arith.constant 0 : i32
    %c0_i32_1 = arith.constant 0 : i32
    return %c0_i32, %c0_i32_0 : i32, i32
  }
  func.func @transform_4(%arg0: i32, %arg1: i32) -> (i32, i32, i32) {
    %c0_i32 = arith.constant 0 : i32
    %c0_i32_0 = arith.constant 0 : i32
    return %arg0, %c0_i32, %arg1 : i32, i32, i32
  }
}

</mosaic_0001>

<bundles_post_ra>
// kernel: tpu_custom_call.1
= control target key start
LH: loop header
LB: loop body
LE: loop exit
PB: predicated region body
PF: predicated region fallthrough
CT: control target
= control target key end

     0   :  { %9 = vsyncpa [#allocation3], 0  ;;  %s730_s0 = inlined_call_operand.vmem [shape: f32[2,4,256], index: 0, kind: input, shape index: {}]   ;;  %s731_s1 = inlined_call_operand.vmem [shape: f32[8,4], index: 1, kind: input, shape index: {}]   ;;  %s732_s2 = inlined_call_operand.vmem [shape: f32[8,1], index: 2, kind: input, shape index: {}]   ;;  %s733_s3 = inlined_call_operand.vmem [shape: f32[8,1], index: 3, kind: input, shape index: {}]   ;;  %s734_s4 = inlined_call_operand.hbm [shape: f32[2,8,256], index: 4, kind: output, shape index: {}]  }
   0x1   :  { %11 = vsyncpa [#allocation3 + $0x1], 0  ;;  %s609_s15 = smov 0   ;;  %s611_s16 = smov 0  }
   0x2   :  { %s613_s17 = smov 0   ;;  %s615_s18 = smov 0  }
   0x3   :  { %s617_s19 = smov 0   ;;  %s619_s20 = smov 0  }
   0x4 LB: > { %s424_s21 = sadd.s32 4294967295, %s579_s20   ;;  %s425_s22 = sadd.s32 4294967294, %s579_s20   ;;  %s579_s20 = sphi %s619_s20, %s17_s20   ;;  %s575_s19 = sphi %s617_s19, %s741_s19   ;;  %s571_s18 = sphi %s615_s18, %s740_s18   ;;  %s567_s17 = sphi %s613_s17, %s739_s17   ;;  %s563_s16 = sphi %s611_s16, %s738_s16   ;;  %s559_s15 = sphi %s609_s15, %s737_s15  }
   0x5   : > { %s29_s23 = sadd.s32 1, %s575_s19  ;;  %s129_s24 = sadd.s32 1, %s567_s17 }
   0x6   : > { %p31_p0 = scmp.ge.s32.totalorder %s29_s23, 2  ;;  %p139_p1 = scmp.ne.s32.totalorder %s567_s17, %s563_s16 }
   0x7   : > { %p140_p2 = scmp.eq.s32.totalorder %s424_s21, 1  ;;  %p145_p3 = scmp.ne.s32.totalorder %s563_s16, %s559_s15 }
   0x8   : > { %s743_s23 = smov (%p31_p0, %s29_s23), 0  ;;  %p146_p5 = scmp.eq.s32.totalorder %s425_s22, 1 }
   0x9   : > { %p649_p4 = por %p140_p2, %p139_p1  ;;  %s124_s26 = ssub.s32 %s575_s19, %s743_s23 }
   0xa   : > { %p428_p6 = scmp.ge.s32.totalorder %s579_s20, 1  ;;  %p127_p7 = scmp.eq.s32.totalorder %s124_s26, 0 }
   0xb   : > { %p656_p8 = por %p146_p5, %p145_p3  ;;  %p186_p9 = scmp.lt.s32.totalorder %s579_s20, 3 }
   0xc   : > { %s662_s28 = scalar_select %p127_p7, %s567_s17, %s129_s24  }
   0xd   : > { %p187_p10 = pnand %p428_p6, %p186_p9 }
   0xe   : > { %p217_p11 = scmp.lt.s32.totalorder (!%p187_p10), %s571_s18, 1  ;;  %v581_v0 = vmov (!%p187_p10), 0.0   ;;  %v582_v1 = vmov (!%p187_p10), 0   ;;  %v311_v2 = vld [vmem:[%s732_s2] sm:$0xff] (!%p187_p10)  ;;  %vm235_vm0 = vcmask (!%p187_p10), 1043456   ;;  %vm231_vm1 = vcmask (!%p187_p10), 31744  }
   0xf   : > { %190 = sbr.rel (%p187_p10) target bundleno = 264 (0x108), region = 36  ;;  %304 = vmatprep.mubr.f32.mxu0 (!%p187_p10), %v581_v0  ;;  %499 = vset.pattern.permute.xlu0 (!%p187_p10), %v582_v1  ;;  %v319_v3 = vld [vmem:[%s733_s3] sm:$0xff] (!%p187_p10)  ;;  %s213_s14 = sand.u32 (!%p187_p10), 1, %s563_s16  }
  0x10   : > { %314 = vperm.xlu0 (!%p187_p10), %499, %v311_v2   ;;  %v227_v6 = vld [vmem:[%s731_s1] sm:$0xff] (!%p187_p10)  ;;  %s429_s21 = sshll.u32 (!%p187_p10), %s213_s14, 4  ;;  %s441_s22 = sshll.u32 (!%p187_p10), %s571_s18, 8 }
  0x11   : > { %s215_s24 = scalar_lea.vmem (!%p187_p10), [#allocation2], %s429_s21  ;;  %s332_s6 = scalar_lea.sflag (!%p187_p10), [#allocation3], %s213_s14 }
  0x12   : > { %s348_s26 = sshll.u32 (!%p187_p10), %s215_s24, 4  ;;  %s685_s26 = int_to_ptr.vmem [resolvable:$true] %s348_s26 }
  0x13   : > { %s501_s7 = scalar_lea.vmem (!%p187_p10), %s685_s26, 256 }
  0x14   : > { %322 = vperm.xlu0 (!%p187_p10), %499, %v319_v3   ;;  %p502_p12 = scmp.ne.s32.totalorder (!%p187_p10), %s685_s26, %s501_s7 }
  0x16   : > { %s218_s5 = scalar_select %p217_p11, %s571_s18, 1 }
  0x17   : > { %p503_p13 = pnand %p502_p12, %p649_p4  ;;  %s583_s18 = smov [#allocation2]  }
  0x18   : > { %s440_s8 = sshll.u32 %s218_s5, 3  ;;  %s683_s5 = scalar_lea.hbm %s734_s4, %s441_s22 }
  0x19   : > { %s224_s11 = scalar_lea.vmem %s730_s0, %s440_s8  ;;  %p504_p0 = pneg %p503_p13 }
  0x1a   : > { %v228_v4 = vld [vmem:[%s224_s11] sm:$0xff]  ;;  %s505_s8 = sshll.u32 %s583_s18, 4  ;;  %s506_s8 = int_to_ptr.vmem [resolvable:$false] %s505_s8 }
  0x1b   : > { %v230_v5 = vcombine.high %v228_v4, %v228_v4  ;;  %s507_s9 = scalar_lea.vmem %s506_s8, 512  ;;  %p508_p1 = scmp.lt.s32.totalorder %s685_s26, %s506_s8 }
  0x1c   : > { %p509_p2 = scmp.lt.s32.totalorder %s507_s9, %s501_s7 }
  0x1d   : > { %432 = vmatprep.subr.msk.mxu0 %vm235_vm0, %v230_v5 }
  0x1e   : > { %433 = vmatpush1.msk.msra.mxu0 %vm235_vm0, %v228_v4  ;;  %p510_p3 = por %p509_p2, %p508_p1 }
  0x1f   : > { %434 = vmatmul.mubr.msk.f32.vlgmr.msra.gmra.mrb[0].mxu0 %vm231_vm1, %v227_v6 }
  0x20   : > { %p511_p5 = pnand %p510_p3, %p504_p0 }
  0x8f   : > { %v315_v7 = vpop.permute.xlu0 %314 }
  0x93   : > { %v323_v11 = vpop.permute.xlu0 %322 }
  0xf2   : > { %v306_v8 = vpop.f32.mrb[0].mxu0 }
  0xf3   : > { %v317_v9 = vmul.f32 %v315_v7, %v306_v8  ;;  %v308_v10 = vpop.f32.mrb[1].mxu0 }
  0xf4   : > { %v318_v12 = vmul.f32 %v315_v7, %v308_v10 }
  0xf5   : > { %v325_v13 = vadd.f32 %v323_v11, %v317_v9 }
  0xf6   : > { %v326_v14 = vadd.f32 %v323_v11, %v318_v12 }
  0xf7   : > { %v327_v15 = vmax.f32 %v325_v13, 0.0 }
  0xf8   : > { %v328_v16 = vmax.f32 %v326_v14, 0.0 }
  0xf9   : > { %329 = vst [vmem:[%s215_s24] sm:$0xff] %v327_v15 }
  0xfa   : > { %330 = vst [vmem:[%s215_s24 + $0x8] sm:$0xff] %v328_v16 }
  0xfb   : > { %514 = shalt.err (!%p511_p5)
}
  0xfc   : > { %s515_s10 = scalar_lea.hbm %s683_s5, 256  ;;  %s519_s13 = scalar_lea.hbm %s734_s4, 512 }
  0xfd   : > { %p516_p6 = scmp.ne.s32.totalorder %s683_s5, %s515_s10  ;;  %p520_p10 = scmp.lt.u32.totalorder %s683_s5, %s734_s4 }
  0xfe   : > { %p521_p11 = scmp.lt.u32.totalorder %s519_s13, %s515_s10  ;;  %p523_p13 = scmp.lt.u32.totalorder %s515_s10, %s683_s5 }
  0xff   : > { %p517_p7 = pnand %p516_p6, %p649_p4 }
 0x100   : > { %p522_p12 = por %p521_p11, %p520_p10 }
 0x101   : > { %p518_p9 = pneg %p517_p7 }
 0x102   : > { %p524_p0 = por %p523_p13, %p522_p12 }
 0x104   : > { %p525_p1 = pnand %p524_p0, %p518_p9 }
 0x106   : > { %528 = shalt.err (!%p525_p1)
}
 0x107   : > { %442 = dma.vmem_to_hbm [thread:$0]  (%p649_p4), %s685_s26, 256, %s683_s5, %s332_s6  }
 0x108 PF: > { %p448_p2 = scmp.ge.s32.totalorder %s579_s20, 2  ;;  %s360_s22 = sand.u32 1, %s559_s15  }
 0x109   : > { %s361_s24 = scalar_lea.sflag [#allocation3], %s360_s22 }
 0x10a   : > { %p445_p3 = pnand %p448_p2, %p656_p8 }
 0x10c   : > { %554 = dma.done.wait (!%p445_p3), %s361_s24, 256  }
 0x10d   : > { %556 = vsyncadd (!%p445_p3), %s361_s24, 4294967040  ;;  %s17_s20 = sadd.s32 1, %s579_s20   ;;  %s737_s15 = smov %s563_s16 }
 0x10e   : > { %p14_p5 = scmp.ge.s32.totalorder %s17_s20, 4   ;;  %s738_s16 = smov %s567_s17 }
 0x10f   : > { %s739_s17 = smov %s662_s28  ;;  %s740_s18 = smov %s575_s19 }
 0x110   : > { %s741_s19 = smov %s743_s23  ;;  %16 = sbr.rel (!%p14_p5) target bundleno = 4 (0x4), region = 71 }
 0x117   :  { %366 = vsyncpa [#allocation3], 1 }
 0x118   :  { %368 = vsyncpa [#allocation3 + $0x1], 1 }

</bundles_post_ra>
